<compile_context>
chip_gen: v7x
topology: tpu7x:2x2x1
jax: 0.10.0
libtpu: 0.0.40
codegen_flags: <defaults>
</compile_context>

<pallas_src>
import functools

import jax
import jax.numpy as jnp
import numpy as np
from jax import lax
from jax.experimental import pallas as pl
from jax.experimental.pallas import tpu as pltpu


def _round_up(x, m):
    return ((x + m - 1) // m) * m


def _pick_time_chunk(s, max_chunk=64):
    """Time-steps per grid step. Big enough to amortize per-step overhead; S is padded up
    to a multiple of the chunk, so no divisor search / no degenerate tiny chunks."""
    if s <= max_chunk:
        return s
    best, best_pad = max_chunk, _round_up(s, max_chunk)
    for c in range(max_chunk, max_chunk // 2, -1):
        p = _round_up(s, c)
        if p < best_pad:
            best, best_pad = c, p
    return best


# ---------------------------------------------------------------------------
# Fused kernel: input projection + recurrence + FC head, one time-chunk per grid step.
# All 2-D tiles; the (time, batch) axes are flattened so every matmul is a clean MXU dot.
# ---------------------------------------------------------------------------
def _make_fused_kernel(t_chunk, b_pad, seq_len, unroll):
    last_chunk = (seq_len - 1) // t_chunk          # grid step containing the last real t
    last_local = (seq_len - 1) % t_chunk           # its local index inside the chunk

    def kernel(x_ref, wih_ref, whh_ref, wfc_ref, brnn_ref, bfc_ref, h0_ref,
               out_ref, hlast_ref, h_scr, xp_scr, hall_scr):
        c = pl.program_id(0)

        @pl.when(c == 0)
        def _():
            h_scr[...] = h0_ref[...]

        # (1) hoisted input projection for the whole chunk (parallel, MXU-friendly).
        #     bf16 x / W_ih with f32 accumulation when compute_dtype=bf16.
        xp_scr[...] = (jnp.dot(x_ref[...], wih_ref[...],
                               preferred_element_type=jnp.float32)
                       + brnn_ref[...])

        # (2) the true recurrence: tiny dependent matmul chain, hidden lives in VMEM (f32).
        def step(i, carry):
            row = pl.multiple_of(i * b_pad, b_pad)
            h_new = jnp.tanh(
                xp_scr[pl.ds(row, b_pad), :]
                + jnp.dot(h_scr[...], whh_ref[...],
                          preferred_element_type=jnp.float32))
            h_scr[...] = h_new
            hall_scr[pl.ds(row, b_pad), :] = h_new
            return carry

        lax.fori_loop(0, t_chunk, step, 0, unroll=unroll)

        # hidden state at the last *real* timestep (S may be padded up to S_pad).
        @pl.when(c == last_chunk)
        def _():
            hlast_ref[...] = hall_scr[pl.ds(last_local * b_pad, b_pad), :]

        # (3) hoisted FC projection for the whole chunk; lane-dense (V_pad) store.
        out_ref[...] = (jnp.dot(hall_scr[...].astype(wfc_ref.dtype), wfc_ref[...],
                                preferred_element_type=jnp.float32)
                        + bfc_ref[...]).astype(out_ref.dtype)

    return kernel


@functools.partial(jax.jit, static_argnames=("compute_dtype",))
def word_rnn_forward(x, h0, w_ih, w_hh, b_ih, b_hh, w_fc, b_fc,
                     compute_dtype=jnp.float32):
    """x: (S,B,V)  h0: (1,B,H)  w_ih: (H,V)  w_hh: (H,H)  w_fc: (V,H).
    Returns (out: (S,B,V), hidden: (1,B,H)) matching the PyTorch module.
    compute_dtype controls MXU operands of the two projections (f32 or bf16);
    the recurrence (W_hh, hidden state, tanh) is always f32.
    """
    if x.ndim == 2:                       # matches the PyTorch x.unsqueeze(0) path
        x = x[None]
    S, B, V = x.shape
    H = h0.shape[-1]

    cd = compute_dtype
    sub = 16 if cd == jnp.bfloat16 else 8          # bf16 sublane tile is (16,128)
    B_pad = _round_up(B, sub)
    H_pad = _round_up(H, 128)
    V_pad = _round_up(V, 128)
    t_chunk = _pick_time_chunk(S)
    S_pad = _round_up(S, t_chunk)
    unroll = max(1, min(8, t_chunk))
    f32 = jnp.float32

    # One-shot pad + cast (no extra full-precision HBM copies beyond this).
    x_p = jnp.pad(x.astype(cd), ((0, S_pad - S), (0, B_pad - B), (0, V_pad - V)))
    x_p = x_p.reshape(S_pad * B_pad, V_pad)
    h0_p = jnp.pad(h0[0].astype(f32), ((0, B_pad - B), (0, H_pad - H)))
    wih_p = jnp.pad(w_ih.T.astype(cd), ((0, V_pad - V), (0, H_pad - H)))
    whh_p = jnp.pad(w_hh.T.astype(f32), ((0, H_pad - H), (0, H_pad - H)))
    wfc_p = jnp.pad(w_fc.T.astype(cd), ((0, H_pad - H), (0, V_pad - V)))
    brnn_p = jnp.pad((b_ih + b_hh).astype(f32)[None, :], ((0, 0), (0, H_pad - H)))
    bfc_p = jnp.pad(b_fc.astype(f32)[None, :], ((0, 0), (0, V_pad - V)))

    rows = t_chunk * B_pad                          # rows per chunk (multiple of 8/16)
    grid = (S_pad // t_chunk,)

    out_p, hlast_p = pl.pallas_call(
        _make_fused_kernel(t_chunk, B_pad, S, unroll),
        out_shape=(jax.ShapeDtypeStruct((S_pad * B_pad, V_pad), f32),
                   jax.ShapeDtypeStruct((B_pad, H_pad), f32)),
        grid_spec=pltpu.PrefetchScalarGridSpec(
            num_scalar_prefetch=0,
            grid=grid,
            in_specs=[
                pl.BlockSpec((rows, V_pad), lambda c: (c, 0)),    # x chunk
                pl.BlockSpec((V_pad, H_pad), lambda c: (0, 0)),   # W_ih^T   (resident)
                pl.BlockSpec((H_pad, H_pad), lambda c: (0, 0)),   # W_hh^T   (resident, f32)
                pl.BlockSpec((H_pad, V_pad), lambda c: (0, 0)),   # W_fc^T   (resident)
                pl.BlockSpec((1, H_pad), lambda c: (0, 0)),       # b_ih + b_hh
                pl.BlockSpec((1, V_pad), lambda c: (0, 0)),       # b_fc
                pl.BlockSpec((B_pad, H_pad), lambda c: (0, 0)),   # h0
            ],
            out_specs=[
                pl.BlockSpec((rows, V_pad), lambda c: (c, 0)),    # logits chunk
                pl.BlockSpec((B_pad, H_pad), lambda c: (0, 0)),   # h at step S-1 (resident)
            ],
            scratch_shapes=[
                pltpu.VMEM((B_pad, H_pad), f32),                  # carried hidden state
                pltpu.VMEM((rows, H_pad), f32),                   # xp chunk
                pltpu.VMEM((rows, H_pad), f32),                   # h chunk for the FC head
            ],
        ),
        compiler_params=pltpu.CompilerParams(
            dimension_semantics=("arbitrary",)),                  # recurrence is sequential
    )(x_p, wih_p, whh_p, wfc_p, brnn_p, bfc_p, h0_p)

    out = out_p.reshape(S_pad, B_pad, V_pad)[:S, :B, :V]
    hidden = hlast_p[:B, :H][None]
    return out, hidden


def reference_forward(x, h0, wih, whh, bih, bhh, wfc, bfc):
    """Pure-JAX reference matching torch nn.RNN + nn.Linear semantics."""
    def step(h, x_t):
        h_new = jnp.tanh(x_t @ wih.T + bih + h @ whh.T + bhh)
        return h_new, h_new

    h_last, hs = jax.lax.scan(step, h0[0], x)
    out = hs @ wfc.T + bfc
    return out, h_last[None]


if __name__ == "__main__":
    seq_len, batch, vocab_size, hidden_size = 8, 2, 16, 32

    key = jax.random.PRNGKey(0)
    ks = jax.random.split(key, 8)
    bound = 1.0 / np.sqrt(hidden_size)   # PyTorch default U(-1/sqrt(H), 1/sqrt(H))

    W_ih = jax.random.uniform(ks[0], (hidden_size, vocab_size), jnp.float32, -bound, bound)
    W_hh = jax.random.uniform(ks[1], (hidden_size, hidden_size), jnp.float32, -bound, bound)
    b_ih = jax.random.uniform(ks[2], (hidden_size,), jnp.float32, -bound, bound)
    b_hh = jax.random.uniform(ks[3], (hidden_size,), jnp.float32, -bound, bound)
    W_fc = jax.random.uniform(ks[4], (vocab_size, hidden_size), jnp.float32, -bound, bound)
    b_fc = jax.random.uniform(ks[5], (vocab_size,), jnp.float32, -bound, bound)

    x = jax.random.normal(ks[6], (seq_len, batch, vocab_size), jnp.float32)
    h0 = jnp.zeros((1, batch, hidden_size), jnp.float32)   # init_hidden()

    out_ref, hidden_ref = reference_forward(x, h0, W_ih, W_hh, b_ih, b_hh, W_fc, b_fc)

    # f32 path (exact-ish)
    out, hidden = word_rnn_forward(x, h0, W_ih, W_hh, b_ih, b_hh, W_fc, b_fc)
    out = jax.block_until_ready(out)
    hidden = jax.block_until_ready(hidden)
    np.testing.assert_allclose(np.asarray(out), np.asarray(out_ref), atol=1e-4, rtol=1e-4)
    np.testing.assert_allclose(np.asarray(hidden), np.asarray(hidden_ref), atol=1e-4, rtol=1e-4)

    # bf16 MXU-operand path (f32 accumulation / f32 recurrence) — looser tolerance
    out_b, hidden_b = word_rnn_forward(x, h0, W_ih, W_hh, b_ih, b_hh, W_fc, b_fc,
                                       compute_dtype=jnp.bfloat16)
    out_b = jax.block_until_ready(out_b)
    hidden_b = jax.block_until_ready(hidden_b)
    np.testing.assert_allclose(np.asarray(out_b), np.asarray(out_ref), atol=7.5e-2, rtol=7.5e-2)
    np.testing.assert_allclose(np.asarray(hidden_b), np.asarray(hidden_ref), atol=7.5e-2, rtol=7.5e-2)

    print("KERNEL_OK")
</pallas_src>

<mosaic_0001>
module attributes {stable_mosaic.version = 11 : i64} {
  func.func @kernel(%arg0: i32, %arg1: memref<64x128xf32, #tpu.memory_space<vmem>>, %arg2: memref<128x128xf32, #tpu.memory_space<vmem>>, %arg3: memref<128x128xf32, #tpu.memory_space<vmem>>, %arg4: memref<128x128xf32, #tpu.memory_space<vmem>>, %arg5: memref<1x128xf32, #tpu.memory_space<vmem>>, %arg6: memref<1x128xf32, #tpu.memory_space<vmem>>, %arg7: memref<8x128xf32, #tpu.memory_space<vmem>>, %arg8: memref<64x128xf32, #tpu.memory_space<vmem>>, %arg9: memref<8x128xf32, #tpu.memory_space<vmem>>, %arg10: memref<8x128xf32, #tpu.memory_space<vmem>>, %arg11: memref<64x128xf32, #tpu.memory_space<vmem>>, %arg12: memref<64x128xf32, #tpu.memory_space<vmem>>) attributes {dimension_semantics = [#tpu.dimension_semantics<arbitrary>], iteration_bounds = array<i64: 1>, scalar_prefetch = 0 : i64, scratch_operands = 3 : i64, tpu.core_type = #tpu.core_type<tc>, window_params = [{transform_indices = @transform_0, window_bounds = array<i64: 64, 128>}, {pipeline_mode = #tpu.pipeline_mode<synchronous>, transform_indices = @transform_1, window_bounds = array<i64: 128, 128>}, {pipeline_mode = #tpu.pipeline_mode<synchronous>, transform_indices = @transform_2, window_bounds = array<i64: 128, 128>}, {pipeline_mode = #tpu.pipeline_mode<synchronous>, transform_indices = @transform_3, window_bounds = array<i64: 128, 128>}, {pipeline_mode = #tpu.pipeline_mode<synchronous>, transform_indices = @transform_4, window_bounds = array<i64: 1, 128>}, {pipeline_mode = #tpu.pipeline_mode<synchronous>, transform_indices = @transform_5, window_bounds = array<i64: 1, 128>}, {pipeline_mode = #tpu.pipeline_mode<synchronous>, transform_indices = @transform_6, window_bounds = array<i64: 8, 128>}, {transform_indices = @transform_7, window_bounds = array<i64: 64, 128>}, {pipeline_mode = #tpu.pipeline_mode<synchronous>, transform_indices = @transform_8, window_bounds = array<i64: 8, 128>}]} {
    %c0_i32 = arith.constant 0 : i32
    %0 = arith.cmpi eq, %arg0, %c0_i32 : i32
    %1 = arith.extui %0 : i1 to i32
    %c0_i32_0 = arith.constant 0 : i32
    %2 = arith.cmpi ne, %1, %c0_i32_0 : i32
    scf.if %2 {
      %c0_100 = arith.constant 0 : index
      %c0_101 = arith.constant 0 : index
      %116 = vector.load %arg7[%c0_100, %c0_101] : memref<8x128xf32, #tpu.memory_space<vmem>>, vector<8x128xf32>
      %c0_102 = arith.constant 0 : index
      %c0_103 = arith.constant 0 : index
      %117 = vector.load %arg10[%c0_102, %c0_103] : memref<8x128xf32, #tpu.memory_space<vmem>>, vector<8x128xf32>
      tpu.vector_store %arg10[%c0_102, %c0_103], %116 {strides = array<i32>} : memref<8x128xf32, #tpu.memory_space<vmem>>, vector<8x128xf32>,
    } else {
    }
    %c0 = arith.constant 0 : index
    %c0_1 = arith.constant 0 : index
    %3 = vector.load %arg1[%c0, %c0_1] : memref<64x128xf32, #tpu.memory_space<vmem>>, vector<64x128xf32>
    %c0_2 = arith.constant 0 : index
    %c0_3 = arith.constant 0 : index
    %4 = vector.load %arg2[%c0_2, %c0_3] : memref<128x128xf32, #tpu.memory_space<vmem>>, vector<128x128xf32>
    %cst = arith.constant dense<0.000000e+00> : vector<64x128xf32>
    %5 = tpu.matmul %3, %4, %cst {dimension_numbers = #tpu.dot_dimension_numbers<[1], [0], [0], [1], [0, 0, 1, 1], [], []>} : vector<64x128xf32>, vector<128x128xf32>, vector<64x128xf32> -> vector<64x128xf32>
    %c0_4 = arith.constant 0 : index
    %c0_5 = arith.constant 0 : index
    %6 = vector.load %arg5[%c0_4, %c0_5] : memref<1x128xf32, #tpu.memory_space<vmem>>, vector<1x128xf32>
    %7 = vector.broadcast %6 : vector<1x128xf32> to vector<64x128xf32>
    %8 = arith.addf %5, %7 : vector<64x128xf32>
    %c0_6 = arith.constant 0 : index
    %c0_7 = arith.constant 0 : index
    %9 = vector.load %arg11[%c0_6, %c0_7] : memref<64x128xf32, #tpu.memory_space<vmem>>, vector<64x128xf32>
    tpu.vector_store %arg11[%c0_6, %c0_7], %8 {strides = array<i32>} : memref<64x128xf32, #tpu.memory_space<vmem>>, vector<64x128xf32>,
    %c0_i32_8 = arith.constant 0 : i32
    %c8_i32 = arith.constant 8 : i32
    %10 = arith.muli %c0_i32_8, %c8_i32 : i32
    %11 = tpu.assume_multiple %10, 8 : i32
    %12 = arith.index_cast %11 : i32 to index
    %c0_9 = arith.constant 0 : index
    %13 = vector.load %arg11[%12, %c0_9] : memref<64x128xf32, #tpu.memory_space<vmem>>, vector<8x128xf32>
    %c0_10 = arith.constant 0 : index
    %c0_11 = arith.constant 0 : index
    %14 = vector.load %arg10[%c0_10, %c0_11] : memref<8x128xf32, #tpu.memory_space<vmem>>, vector<8x128xf32>
    %c0_12 = arith.constant 0 : index
    %c0_13 = arith.constant 0 : index
    %15 = vector.load %arg3[%c0_12, %c0_13] : memref<128x128xf32, #tpu.memory_space<vmem>>, vector<128x128xf32>
    %cst_14 = arith.constant dense<0.000000e+00> : vector<8x128xf32>
    %16 = tpu.matmul %14, %15, %cst_14 {dimension_numbers = #tpu.dot_dimension_numbers<[1], [0], [0], [1], [0, 0, 1, 1], [], []>} : vector<8x128xf32>, vector<128x128xf32>, vector<8x128xf32> -> vector<8x128xf32>
    %17 = arith.addf %13, %16 : vector<8x128xf32>
    %18 = math.tanh %17 : vector<8x128xf32>
    %c0_15 = arith.constant 0 : index
    %c0_16 = arith.constant 0 : index
    %19 = vector.load %arg10[%c0_15, %c0_16] : memref<8x128xf32, #tpu.memory_space<vmem>>, vector<8x128xf32>
    tpu.vector_store %arg10[%c0_15, %c0_16], %18 {strides = array<i32>} : memref<8x128xf32, #tpu.memory_space<vmem>>, vector<8x128xf32>,
    %20 = arith.index_cast %11 : i32 to index
    %c0_17 = arith.constant 0 : index
    %21 = vector.load %arg12[%20, %c0_17] : memref<64x128xf32, #tpu.memory_space<vmem>>, vector<8x128xf32>
    tpu.vector_store %arg12[%20, %c0_17], %18 {strides = array<i32>} : memref<64x128xf32, #tpu.memory_space<vmem>>, vector<8x128xf32>,
    %c1_i32 = arith.constant 1 : i32
    %c8_i32_18 = arith.constant 8 : i32
    %22 = arith.muli %c1_i32, %c8_i32_18 : i32
    %23 = tpu.assume_multiple %22, 8 : i32
    %24 = arith.index_cast %23 : i32 to index
    %c0_19 = arith.constant 0 : index
    %25 = vector.load %arg11[%24, %c0_19] : memref<64x128xf32, #tpu.memory_space<vmem>>, vector<8x128xf32>
    %c0_20 = arith.constant 0 : index
    %c0_21 = arith.constant 0 : index
    %26 = vector.load %arg10[%c0_20, %c0_21] : memref<8x128xf32, #tpu.memory_space<vmem>>, vector<8x128xf32>
    %c0_22 = arith.constant 0 : index
    %c0_23 = arith.constant 0 : index
    %27 = vector.load %arg3[%c0_22, %c0_23] : memref<128x128xf32, #tpu.memory_space<vmem>>, vector<128x128xf32>
    %cst_24 = arith.constant dense<0.000000e+00> : vector<8x128xf32>
    %28 = tpu.matmul %26, %27, %cst_24 {dimension_numbers = #tpu.dot_dimension_numbers<[1], [0], [0], [1], [0, 0, 1, 1], [], []>} : vector<8x128xf32>, vector<128x128xf32>, vector<8x128xf32> -> vector<8x128xf32>
    %29 = arith.addf %25, %28 : vector<8x128xf32>
    %30 = math.tanh %29 : vector<8x128xf32>
    %c0_25 = arith.constant 0 : index
    %c0_26 = arith.constant 0 : index
    %31 = vector.load %arg10[%c0_25, %c0_26] : memref<8x128xf32, #tpu.memory_space<vmem>>, vector<8x128xf32>
    tpu.vector_store %arg10[%c0_25, %c0_26], %30 {strides = array<i32>} : memref<8x128xf32, #tpu.memory_space<vmem>>, vector<8x128xf32>,
    %32 = arith.index_cast %23 : i32 to index
    %c0_27 = arith.constant 0 : index
    %33 = vector.load %arg12[%32, %c0_27] : memref<64x128xf32, #tpu.memory_space<vmem>>, vector<8x128xf32>
    tpu.vector_store %arg12[%32, %c0_27], %30 {strides = array<i32>} : memref<64x128xf32, #tpu.memory_space<vmem>>, vector<8x128xf32>,
    %c2_i32 = arith.constant 2 : i32
    %c8_i32_28 = arith.constant 8 : i32
    %34 = arith.muli %c2_i32, %c8_i32_28 : i32
    %35 = tpu.assume_multiple %34, 8 : i32
    %36 = arith.index_cast %35 : i32 to index
    %c0_29 = arith.constant 0 : index
    %37 = vector.load %arg11[%36, %c0_29] : memref<64x128xf32, #tpu.memory_space<vmem>>, vector<8x128xf32>
    %c0_30 = arith.constant 0 : index
    %c0_31 = arith.constant 0 : index
    %38 = vector.load %arg10[%c0_30, %c0_31] : memref<8x128xf32, #tpu.memory_space<vmem>>, vector<8x128xf32>
    %c0_32 = arith.constant 0 : index
    %c0_33 = arith.constant 0 : index
    %39 = vector.load %arg3[%c0_32, %c0_33] : memref<128x128xf32, #tpu.memory_space<vmem>>, vector<128x128xf32>
    %cst_34 = arith.constant dense<0.000000e+00> : vector<8x128xf32>
    %40 = tpu.matmul %38, %39, %cst_34 {dimension_numbers = #tpu.dot_dimension_numbers<[1], [0], [0], [1], [0, 0, 1, 1], [], []>} : vector<8x128xf32>, vector<128x128xf32>, vector<8x128xf32> -> vector<8x128xf32>
    %41 = arith.addf %37, %40 : vector<8x128xf32>
    %42 = math.tanh %41 : vector<8x128xf32>
    %c0_35 = arith.constant 0 : index
    %c0_36 = arith.constant 0 : index
    %43 = vector.load %arg10[%c0_35, %c0_36] : memref<8x128xf32, #tpu.memory_space<vmem>>, vector<8x128xf32>
    tpu.vector_store %arg10[%c0_35, %c0_36], %42 {strides = array<i32>} : memref<8x128xf32, #tpu.memory_space<vmem>>, vector<8x128xf32>,
    %44 = arith.index_cast %35 : i32 to index
    %c0_37 = arith.constant 0 : index
    %45 = vector.load %arg12[%44, %c0_37] : memref<64x128xf32, #tpu.memory_space<vmem>>, vector<8x128xf32>
    tpu.vector_store %arg12[%44, %c0_37], %42 {strides = array<i32>} : memref<64x128xf32, #tpu.memory_space<vmem>>, vector<8x128xf32>,
    %c3_i32 = arith.constant 3 : i32
    %c8_i32_38 = arith.constant 8 : i32
    %46 = arith.muli %c3_i32, %c8_i32_38 : i32
    %47 = tpu.assume_multiple %46, 8 : i32
    %48 = arith.index_cast %47 : i32 to index
    %c0_39 = arith.constant 0 : index
    %49 = vector.load %arg11[%48, %c0_39] : memref<64x128xf32, #tpu.memory_space<vmem>>, vector<8x128xf32>
    %c0_40 = arith.constant 0 : index
    %c0_41 = arith.constant 0 : index
    %50 = vector.load %arg10[%c0_40, %c0_41] : memref<8x128xf32, #tpu.memory_space<vmem>>, vector<8x128xf32>
    %c0_42 = arith.constant 0 : index
    %c0_43 = arith.constant 0 : index
    %51 = vector.load %arg3[%c0_42, %c0_43] : memref<128x128xf32, #tpu.memory_space<vmem>>, vector<128x128xf32>
    %cst_44 = arith.constant dense<0.000000e+00> : vector<8x128xf32>
    %52 = tpu.matmul %50, %51, %cst_44 {dimension_numbers = #tpu.dot_dimension_numbers<[1], [0], [0], [1], [0, 0, 1, 1], [], []>} : vector<8x128xf32>, vector<128x128xf32>, vector<8x128xf32> -> vector<8x128xf32>
    %53 = arith.addf %49, %52 : vector<8x128xf32>
    %54 = math.tanh %53 : vector<8x128xf32>
    %c0_45 = arith.constant 0 : index
    %c0_46 = arith.constant 0 : index
    %55 = vector.load %arg10[%c0_45, %c0_46] : memref<8x128xf32, #tpu.memory_space<vmem>>, vector<8x128xf32>
    tpu.vector_store %arg10[%c0_45, %c0_46], %54 {strides = array<i32>} : memref<8x128xf32, #tpu.memory_space<vmem>>, vector<8x128xf32>,
    %56 = arith.index_cast %47 : i32 to index
    %c0_47 = arith.constant 0 : index
    %57 = vector.load %arg12[%56, %c0_47] : memref<64x128xf32, #tpu.memory_space<vmem>>, vector<8x128xf32>
    tpu.vector_store %arg12[%56, %c0_47], %54 {strides = array<i32>} : memref<64x128xf32, #tpu.memory_space<vmem>>, vector<8x128xf32>,
    %c4_i32 = arith.constant 4 : i32
    %c8_i32_48 = arith.constant 8 : i32
    %58 = arith.muli %c4_i32, %c8_i32_48 : i32
    %59 = tpu.assume_multiple %58, 8 : i32
    %60 = arith.index_cast %59 : i32 to index
    %c0_49 = arith.constant 0 : index
    %61 = vector.load %arg11[%60, %c0_49] : memref<64x128xf32, #tpu.memory_space<vmem>>, vector<8x128xf32>
    %c0_50 = arith.constant 0 : index
    %c0_51 = arith.constant 0 : index
    %62 = vector.load %arg10[%c0_50, %c0_51] : memref<8x128xf32, #tpu.memory_space<vmem>>, vector<8x128xf32>
    %c0_52 = arith.constant 0 : index
    %c0_53 = arith.constant 0 : index
    %63 = vector.load %arg3[%c0_52, %c0_53] : memref<128x128xf32, #tpu.memory_space<vmem>>, vector<128x128xf32>
    %cst_54 = arith.constant dense<0.000000e+00> : vector<8x128xf32>
    %64 = tpu.matmul %62, %63, %cst_54 {dimension_numbers = #tpu.dot_dimension_numbers<[1], [0], [0], [1], [0, 0, 1, 1], [], []>} : vector<8x128xf32>, vector<128x128xf32>, vector<8x128xf32> -> vector<8x128xf32>
    %65 = arith.addf %61, %64 : vector<8x128xf32>
    %66 = math.tanh %65 : vector<8x128xf32>
    %c0_55 = arith.constant 0 : index
    %c0_56 = arith.constant 0 : index
    %67 = vector.load %arg10[%c0_55, %c0_56] : memref<8x128xf32, #tpu.memory_space<vmem>>, vector<8x128xf32>
    tpu.vector_store %arg10[%c0_55, %c0_56], %66 {strides = array<i32>} : memref<8x128xf32, #tpu.memory_space<vmem>>, vector<8x128xf32>,
    %68 = arith.index_cast %59 : i32 to index
    %c0_57 = arith.constant 0 : index
    %69 = vector.load %arg12[%68, %c0_57] : memref<64x128xf32, #tpu.memory_space<vmem>>, vector<8x128xf32>
    tpu.vector_store %arg12[%68, %c0_57], %66 {strides = array<i32>} : memref<64x128xf32, #tpu.memory_space<vmem>>, vector<8x128xf32>,
    %c5_i32 = arith.constant 5 : i32
    %c8_i32_58 = arith.constant 8 : i32
    %70 = arith.muli %c5_i32, %c8_i32_58 : i32
    %71 = tpu.assume_multiple %70, 8 : i32
    %72 = arith.index_cast %71 : i32 to index
    %c0_59 = arith.constant 0 : index
    %73 = vector.load %arg11[%72, %c0_59] : memref<64x128xf32, #tpu.memory_space<vmem>>, vector<8x128xf32>
    %c0_60 = arith.constant 0 : index
    %c0_61 = arith.constant 0 : index
    %74 = vector.load %arg10[%c0_60, %c0_61] : memref<8x128xf32, #tpu.memory_space<vmem>>, vector<8x128xf32>
    %c0_62 = arith.constant 0 : index
    %c0_63 = arith.constant 0 : index
    %75 = vector.load %arg3[%c0_62, %c0_63] : memref<128x128xf32, #tpu.memory_space<vmem>>, vector<128x128xf32>
    %cst_64 = arith.constant dense<0.000000e+00> : vector<8x128xf32>
    %76 = tpu.matmul %74, %75, %cst_64 {dimension_numbers = #tpu.dot_dimension_numbers<[1], [0], [0], [1], [0, 0, 1, 1], [], []>} : vector<8x128xf32>, vector<128x128xf32>, vector<8x128xf32> -> vector<8x128xf32>
    %77 = arith.addf %73, %76 : vector<8x128xf32>
    %78 = math.tanh %77 : vector<8x128xf32>
    %c0_65 = arith.constant 0 : index
    %c0_66 = arith.constant 0 : index
    %79 = vector.load %arg10[%c0_65, %c0_66] : memref<8x128xf32, #tpu.memory_space<vmem>>, vector<8x128xf32>
    tpu.vector_store %arg10[%c0_65, %c0_66], %78 {strides = array<i32>} : memref<8x128xf32, #tpu.memory_space<vmem>>, vector<8x128xf32>,
    %80 = arith.index_cast %71 : i32 to index
    %c0_67 = arith.constant 0 : index
    %81 = vector.load %arg12[%80, %c0_67] : memref<64x128xf32, #tpu.memory_space<vmem>>, vector<8x128xf32>
    tpu.vector_store %arg12[%80, %c0_67], %78 {strides = array<i32>} : memref<64x128xf32, #tpu.memory_space<vmem>>, vector<8x128xf32>,
    %c6_i32 = arith.constant 6 : i32
    %c8_i32_68 = arith.constant 8 : i32
    %82 = arith.muli %c6_i32, %c8_i32_68 : i32
    %83 = tpu.assume_multiple %82, 8 : i32
    %84 = arith.index_cast %83 : i32 to index
    %c0_69 = arith.constant 0 : index
    %85 = vector.load %arg11[%84, %c0_69] : memref<64x128xf32, #tpu.memory_space<vmem>>, vector<8x128xf32>
    %c0_70 = arith.constant 0 : index
    %c0_71 = arith.constant 0 : index
    %86 = vector.load %arg10[%c0_70, %c0_71] : memref<8x128xf32, #tpu.memory_space<vmem>>, vector<8x128xf32>
    %c0_72 = arith.constant 0 : index
    %c0_73 = arith.constant 0 : index
    %87 = vector.load %arg3[%c0_72, %c0_73] : memref<128x128xf32, #tpu.memory_space<vmem>>, vector<128x128xf32>
    %cst_74 = arith.constant dense<0.000000e+00> : vector<8x128xf32>
    %88 = tpu.matmul %86, %87, %cst_74 {dimension_numbers = #tpu.dot_dimension_numbers<[1], [0], [0], [1], [0, 0, 1, 1], [], []>} : vector<8x128xf32>, vector<128x128xf32>, vector<8x128xf32> -> vector<8x128xf32>
    %89 = arith.addf %85, %88 : vector<8x128xf32>
    %90 = math.tanh %89 : vector<8x128xf32>
    %c0_75 = arith.constant 0 : index
    %c0_76 = arith.constant 0 : index
    %91 = vector.load %arg10[%c0_75, %c0_76] : memref<8x128xf32, #tpu.memory_space<vmem>>, vector<8x128xf32>
    tpu.vector_store %arg10[%c0_75, %c0_76], %90 {strides = array<i32>} : memref<8x128xf32, #tpu.memory_space<vmem>>, vector<8x128xf32>,
    %92 = arith.index_cast %83 : i32 to index
    %c0_77 = arith.constant 0 : index
    %93 = vector.load %arg12[%92, %c0_77] : memref<64x128xf32, #tpu.memory_space<vmem>>, vector<8x128xf32>
    tpu.vector_store %arg12[%92, %c0_77], %90 {strides = array<i32>} : memref<64x128xf32, #tpu.memory_space<vmem>>, vector<8x128xf32>,
    %c7_i32 = arith.constant 7 : i32
    %c8_i32_78 = arith.constant 8 : i32
    %94 = arith.muli %c7_i32, %c8_i32_78 : i32
    %95 = tpu.assume_multiple %94, 8 : i32
    %96 = arith.index_cast %95 : i32 to index
    %c0_79 = arith.constant 0 : index
    %97 = vector.load %arg11[%96, %c0_79] : memref<64x128xf32, #tpu.memory_space<vmem>>, vector<8x128xf32>
    %c0_80 = arith.constant 0 : index
    %c0_81 = arith.constant 0 : index
    %98 = vector.load %arg10[%c0_80, %c0_81] : memref<8x128xf32, #tpu.memory_space<vmem>>, vector<8x128xf32>
    %c0_82 = arith.constant 0 : index
    %c0_83 = arith.constant 0 : index
    %99 = vector.load %arg3[%c0_82, %c0_83] : memref<128x128xf32, #tpu.memory_space<vmem>>, vector<128x128xf32>
    %cst_84 = arith.constant dense<0.000000e+00> : vector<8x128xf32>
    %100 = tpu.matmul %98, %99, %cst_84 {dimension_numbers = #tpu.dot_dimension_numbers<[1], [0], [0], [1], [0, 0, 1, 1], [], []>} : vector<8x128xf32>, vector<128x128xf32>, vector<8x128xf32> -> vector<8x128xf32>
    %101 = arith.addf %97, %100 : vector<8x128xf32>
    %102 = math.tanh %101 : vector<8x128xf32>
    %c0_85 = arith.constant 0 : index
    %c0_86 = arith.constant 0 : index
    %103 = vector.load %arg10[%c0_85, %c0_86] : memref<8x128xf32, #tpu.memory_space<vmem>>, vector<8x128xf32>
    tpu.vector_store %arg10[%c0_85, %c0_86], %102 {strides = array<i32>} : memref<8x128xf32, #tpu.memory_space<vmem>>, vector<8x128xf32>,
    %104 = arith.index_cast %95 : i32 to index
    %c0_87 = arith.constant 0 : index
    %105 = vector.load %arg12[%104, %c0_87] : memref<64x128xf32, #tpu.memory_space<vmem>>, vector<8x128xf32>
    tpu.vector_store %arg12[%104, %c0_87], %102 {strides = array<i32>} : memref<64x128xf32, #tpu.memory_space<vmem>>, vector<8x128xf32>,
    %c8_i32_88 = arith.constant 8 : i32
    %c0_i32_89 = arith.constant 0 : i32
    %106 = arith.cmpi eq, %arg0, %c0_i32_89 : i32
    %107 = arith.extui %106 : i1 to i32
    %c0_i32_90 = arith.constant 0 : i32
    %108 = arith.cmpi ne, %107, %c0_i32_90 : i32
    scf.if %108 {
      %c56 = arith.constant 56 : index
      %c0_100 = arith.constant 0 : index
      %116 = vector.load %arg12[%c56, %c0_100] : memref<64x128xf32, #tpu.memory_space<vmem>>, vector<8x128xf32>
      %c0_101 = arith.constant 0 : index
      %c0_102 = arith.constant 0 : index
      %117 = vector.load %arg9[%c0_101, %c0_102] : memref<8x128xf32, #tpu.memory_space<vmem>>, vector<8x128xf32>
      tpu.vector_store %arg9[%c0_101, %c0_102], %116 {strides = array<i32>} : memref<8x128xf32, #tpu.memory_space<vmem>>, vector<8x128xf32>,
    } else {
    }
    %c0_91 = arith.constant 0 : index
    %c0_92 = arith.constant 0 : index
    %109 = vector.load %arg12[%c0_91, %c0_92] : memref<64x128xf32, #tpu.memory_space<vmem>>, vector<64x128xf32>
    %c0_93 = arith.constant 0 : index
    %c0_94 = arith.constant 0 : index
    %110 = vector.load %arg4[%c0_93, %c0_94] : memref<128x128xf32, #tpu.memory_space<vmem>>, vector<128x128xf32>
    %cst_95 = arith.constant dense<0.000000e+00> : vector<64x128xf32>
    %111 = tpu.matmul %109, %110, %cst_95 {dimension_numbers = #tpu.dot_dimension_numbers<[1], [0], [0], [1], [0, 0, 1, 1], [], []>} : vector<64x128xf32>, vector<128x128xf32>, vector<64x128xf32> -> vector<64x128xf32>
    %c0_96 = arith.constant 0 : index
    %c0_97 = arith.constant 0 : index
    %112 = vector.load %arg6[%c0_96, %c0_97] : memref<1x128xf32, #tpu.memory_space<vmem>>, vector<1x128xf32>
    %113 = vector.broadcast %112 : vector<1x128xf32> to vector<64x128xf32>
    %114 = arith.addf %111, %113 : vector<64x128xf32>
    %c0_98 = arith.constant 0 : index
    %c0_99 = arith.constant 0 : index
    %115 = vector.load %arg8[%c0_98, %c0_99] : memref<64x128xf32, #tpu.memory_space<vmem>>, vector<64x128xf32>
    tpu.vector_store %arg8[%c0_98, %c0_99], %114 {strides = array<i32>} : memref<64x128xf32, #tpu.memory_space<vmem>>, vector<64x128xf32>,
    return
  }
  func.func @transform_0(%arg0: i32) -> (i32, i32) {
    %c0_i32 = arith.constant 0 : i32
    %c0_i32_0 = arith.constant 0 : i32
    return %arg0, %c0_i32 : i32, i32
  }
  func.func @transform_1(%arg0: i32) -> (i32, i32) {
    %c0_i32 = arith.constant 0 : i32
    %c0_i32_0 = arith.constant 0 : i32
    %c0_i32_1 = arith.constant 0 : i32
    return %c0_i32, %c0_i32_0 : i32, i32
  }
  func.func @transform_2(%arg0: i32) -> (i32, i32) {
    %c0_i32 = arith.constant 0 : i32
    %c0_i32_0 = arith.constant 0 : i32
    %c0_i32_1 = arith.constant 0 : i32
    return %c0_i32, %c0_i32_0 : i32, i32
  }
  func.func @transform_3(%arg0: i32) -> (i32, i32) {
    %c0_i32 = arith.constant 0 : i32
    %c0_i32_0 = arith.constant 0 : i32
    %c0_i32_1 = arith.constant 0 : i32
    return %c0_i32, %c0_i32_0 : i32, i32
  }
  func.func @transform_4(%arg0: i32) -> (i32, i32) {
    %c0_i32 = arith.constant 0 : i32
    %c0_i32_0 = arith.constant 0 : i32
    %c0_i32_1 = arith.constant 0 : i32
    return %c0_i32, %c0_i32_0 : i32, i32
  }
  func.func @transform_5(%arg0: i32) -> (i32, i32) {
    %c0_i32 = arith.constant 0 : i32
    %c0_i32_0 = arith.constant 0 : i32
    %c0_i32_1 = arith.constant 0 : i32
    return %c0_i32, %c0_i32_0 : i32, i32
  }
  func.func @transform_6(%arg0: i32) -> (i32, i32) {
    %c0_i32 = arith.constant 0 : i32
    %c0_i32_0 = arith.constant 0 : i32
    %c0_i32_1 = arith.constant 0 : i32
    return %c0_i32, %c0_i32_0 : i32, i32
  }
  func.func @transform_7(%arg0: i32) -> (i32, i32) {
    %c0_i32 = arith.constant 0 : i32
    %c0_i32_0 = arith.constant 0 : i32
    return %arg0, %c0_i32 : i32, i32
  }
  func.func @transform_8(%arg0: i32) -> (i32, i32) {
    %c0_i32 = arith.constant 0 : i32
    %c0_i32_0 = arith.constant 0 : i32
    %c0_i32_1 = arith.constant 0 : i32
    return %c0_i32, %c0_i32_0 : i32, i32
  }
}

</mosaic_0001>

<bundles_post_ra>
// kernel: word_rnn_forward.1
= control target key start
LH: loop header
LB: loop body
LE: loop exit
PB: predicated region body
PF: predicated region fallthrough
CT: control target
= control target key end

     0   :  { %v1914_v2 = vmov 0.0|0.0   ;;  %vm1915_vm0 = vmmov 0   ;;  %v1916_v4 = vmov 0.0   ;;  %s2368_s1 = inlined_call_operand.vmem [shape: f32[128,128], index: 1, kind: input, shape index: {}]   ;;  %s2369_s2 = inlined_call_operand.vmem [shape: f32[128,128], index: 2, kind: input, shape index: {}]   ;;  %s2370_s0 = inlined_call_operand.vmem [shape: f32[64,128], index: 0, kind: input, shape index: {}]   ;;  %s2371_s6 = inlined_call_operand.vmem [shape: f32[8,128], index: 6, kind: input, shape index: {}]   ;;  %s2372_s4 = inlined_call_operand.vmem [shape: f32[1,128], index: 4, kind: input, shape index: {}]   ;;  %s2373_s3 = inlined_call_operand.vmem [shape: f32[128,128], index: 3, kind: input, shape index: {}]   ;;  %s2374_s5 = inlined_call_operand.vmem [shape: f32[1,128], index: 5, kind: input, shape index: {}]   ;;  %s2375_s7 = inlined_call_operand.vmem [shape: f32[64,128], index: 7, kind: output, shape index: {0}]   ;;  %s2376_s8 = inlined_call_operand.vmem [shape: f32[8,128], index: 8, kind: output, shape index: {1}]  }
   0x1   :  { %v42_v0 = vld [vmem:[%s2368_s1] sm:$0xff]  ;;  %v43_v1 = vld [vmem:[%s2368_s1 + $0x8] sm:$0xff]  ;;  %1671 = vmatprep.subr.bf16.mxu1 %v1914_v2  ;;  %1347 = vmatprep.mubr.msk.f32.mxu1 %vm1915_vm0, %v1916_v4  ;;  %v44_v7 = vld [vmem:[%s2368_s1 + $0x10] sm:$0xff] }
   0x2   :  { %v180_v3 = vld [vmem:[%s2369_s2] sm:$0xff]  ;;  %v1639_v5 = vpack.c.bf16 %v43_v1, %v42_v0  ;;  %v181_v6 = vld [vmem:[%s2369_s2 + $0x8] sm:$0xff]  ;;  %v45_v8 = vld [vmem:[%s2368_s1 + $0x18] sm:$0xff] }
   0x3   :  { %v1983_v9 = vpack.c.bf16 %v181_v6, %v180_v3  ;;  %v1643_v10 = vpack.c.bf16 %v45_v8, %v44_v7  ;;  %v182_v11 = vld [vmem:[%s2369_s2 + $0x10] sm:$0xff]  ;;  %v183_v12 = vld [vmem:[%s2369_s2 + $0x18] sm:$0xff]  ;;  %v46_v13 = vld [vmem:[%s2368_s1 + $0x20] sm:$0xff] }
   0x4   :  { %1640 = vmatprep.subr.bf16.mxu0 %v1639_v5  ;;  %v47_v14 = vld [vmem:[%s2368_s1 + $0x28] sm:$0xff]  ;;  %v1998_v15 = vpack.c.bf16 %v183_v12, %v182_v11  ;;  %v184_v17 = vld [vmem:[%s2369_s2 + $0x20] sm:$0xff]  ;;  %v48_v19 = vld [vmem:[%s2368_s1 + $0x30] sm:$0xff] }
   0x5   :  { %1642 = vmatpush3.bf16.msra.mxu0 %v1639_v5  ;;  %1673 = vmatpush3.bf16.msra.mxu1 %v1983_v9  ;;  %v1647_v16 = vpack.c.bf16 %v47_v14, %v46_v13  ;;  %v185_v18 = vld [vmem:[%s2369_s2 + $0x28] sm:$0xff]  ;;  %v49_v20 = vld [vmem:[%s2368_s1 + $0x38] sm:$0xff]  ;;  %v186_v23 = vld [vmem:[%s2369_s2 + $0x30] sm:$0xff] }
   0x6   :  { %1644 = vmatprep.subr.bf16.mxu0 %v1643_v10  ;;  %1674 = vmatprep.subr.bf16.mxu1 %v1914_v2  ;;  %v2014_v21 = vpack.c.bf16 %v185_v18, %v184_v17  ;;  %v1651_v22 = vpack.c.bf16 %v49_v20, %v48_v19  ;;  %v187_v24 = vld [vmem:[%s2369_s2 + $0x38] sm:$0xff]  ;;  %v50_v25 = vld [vmem:[%s2368_s1 + $0x40] sm:$0xff]  ;;  %v51_v26 = vld [vmem:[%s2368_s1 + $0x48] sm:$0xff] }
   0x7   :  { %v34_v27 = vld [vmem:[%s2370_s0] sm:$0xff]  ;;  %v2033_v28 = vpack.c.bf16 %v187_v24, %v186_v23  ;;  %v1655_v29 = vpack.c.bf16 %v51_v26, %v50_v25  ;;  %v189_v31 = vld [vmem:[%s2369_s2 + $0x48] sm:$0xff]  ;;  %v52_v32 = vld [vmem:[%s2368_s1 + $0x50] sm:$0xff] }
   0x8   :  { %1303 = vmatprep.mubr.f32.mxu0 %v34_v27  ;;  %v188_v30 = vld [vmem:[%s2369_s2 + $0x40] sm:$0xff]  ;;  %v53_v33 = vld [vmem:[%s2368_s1 + $0x58] sm:$0xff]  ;;  %v190_v36 = vld [vmem:[%s2369_s2 + $0x50] sm:$0xff] }
   0x9   :  { %1646 = vmatpush3.bf16.msra.mxu0 %v1643_v10  ;;  %1676 = vmatpush3.bf16.msra.mxu1 %v1998_v15  ;;  %v2049_v34 = vpack.c.bf16 %v189_v31, %v188_v30  ;;  %v1659_v35 = vpack.c.bf16 %v53_v33, %v52_v32  ;;  %v191_v37 = vld [vmem:[%s2369_s2 + $0x58] sm:$0xff]  ;;  %v54_v38 = vld [vmem:[%s2368_s1 + $0x60] sm:$0xff]  ;;  %v55_v39 = vld [vmem:[%s2368_s1 + $0x68] sm:$0xff] }
   0xa   :  { %1648 = vmatprep.subr.bf16.mxu0 %v1647_v16  ;;  %1677 = vmatprep.subr.bf16.mxu1 %v1914_v2  ;;  %v2065_v40 = vpack.c.bf16 %v191_v37, %v190_v36  ;;  %v1663_v41 = vpack.c.bf16 %v55_v39, %v54_v38  ;;  %v192_v42 = vld [vmem:[%s2369_s2 + $0x60] sm:$0xff]  ;;  %v193_v43 = vld [vmem:[%s2369_s2 + $0x68] sm:$0xff]  ;;  %v56_v44 = vld [vmem:[%s2368_s1 + $0x70] sm:$0xff] }
   0xb   :  { %v57_v45 = vld [vmem:[%s2368_s1 + $0x78] sm:$0xff]  ;;  %v2081_v46 = vpack.c.bf16 %v193_v43, %v192_v42  ;;  %v194_v48 = vld [vmem:[%s2369_s2 + $0x70] sm:$0xff]  ;;  %v35_v51 = vld [vmem:[%s2370_s0 + $0x8] sm:$0xff] }
   0xc   :  { %v1667_v47 = vpack.c.bf16 %v57_v45, %v56_v44  ;;  %v195_v49 = vld [vmem:[%s2369_s2 + $0x78] sm:$0xff]  ;;  %v32_v52 = vld [vmem:[%s2371_s6] sm:$0xff]  ;;  %v36_v53 = vld [vmem:[%s2370_s0 + $0x10] sm:$0xff] }
   0xd   :  { %1650 = vmatpush3.bf16.msra.mxu0 %v1647_v16  ;;  %1679 = vmatpush3.bf16.msra.mxu1 %v2014_v21  ;;  %v2091_v50 = vpack.c.bf16 %v195_v49, %v194_v48  ;;  %v37_v54 = vld [vmem:[%s2370_s0 + $0x18] sm:$0xff]  ;;  %v38_v55 = vld [vmem:[%s2370_s0 + $0x20] sm:$0xff]  ;;  %v39_v56 = vld [vmem:[%s2370_s0 + $0x28] sm:$0xff] }
   0xe   :  { %1652 = vmatprep.subr.bf16.mxu0 %v1651_v22  ;;  %1680 = vmatprep.subr.bf16.mxu1 %v1914_v2  ;;  %v40_v57 = vld [vmem:[%s2370_s0 + $0x30] sm:$0xff]  ;;  %v41_v58 = vld [vmem:[%s2370_s0 + $0x38] sm:$0xff]  ;;  %v2160_v59 = vld [vmem:[%s2372_s4] ss:$0 sm:$0xff] }
   0xf   :  { %v944_v37 = vld [vmem:[%s2373_s3 + $0x18] sm:$0xff]  ;;  %v947_v43 = vld [vmem:[%s2373_s3 + $0x30] sm:$0xff] }
  0x10   :  { %v948_v44 = vld [vmem:[%s2373_s3 + $0x38] sm:$0xff]  ;;  %v951_v49 = vld [vmem:[%s2373_s3 + $0x50] sm:$0xff] }
  0x11   :  { %1654 = vmatpush3.bf16.msra.mxu0 %v1651_v22  ;;  %1682 = vmatpush3.bf16.msra.mxu1 %v2033_v28  ;;  %v1875_v45 = vpack.c.bf16 %v948_v44, %v947_v43 }
  0x12   :  { %1656 = vmatprep.subr.bf16.mxu0 %v1655_v29  ;;  %1683 = vmatprep.subr.bf16.mxu1 %v1914_v2 }
  0x15   :  { %1658 = vmatpush3.bf16.msra.mxu0 %v1655_v29  ;;  %1685 = vmatpush3.bf16.msra.mxu1 %v2049_v34 }
  0x16   :  { %1660 = vmatprep.subr.bf16.mxu0 %v1659_v35  ;;  %1686 = vmatprep.subr.bf16.mxu1 %v1914_v2 }
  0x19   :  { %1662 = vmatpush3.bf16.msra.mxu0 %v1659_v35  ;;  %1688 = vmatpush3.bf16.msra.mxu1 %v2065_v40 }
  0x1a   :  { %1664 = vmatprep.subr.bf16.mxu0 %v1663_v41  ;;  %1689 = vmatprep.subr.bf16.mxu1 %v1914_v2 }
  0x1d   :  { %1666 = vmatpush3.bf16.msra.mxu0 %v1663_v41  ;;  %1691 = vmatpush3.bf16.msra.mxu1 %v2081_v46  ;;  %v946_v41 = vld [vmem:[%s2373_s3 + $0x28] sm:$0xff] }
  0x1e   :  { %1668 = vmatprep.subr.bf16.mxu0 %v1667_v47  ;;  %1692 = vmatprep.subr.bf16.mxu1 %v1914_v2 }
  0x21   :  { %1670 = vmatpush3.bf16.msra.mxu0 %v1667_v47  ;;  %1694 = vmatpush3.bf16.msra.mxu1 %v2091_v50  ;;  %v950_v47 = vld [vmem:[%s2373_s3 + $0x48] sm:$0xff] }
  0x22   :  { %1695 = vmatprep.subr.bf16.mxu0 %v1914_v2  ;;  %1719 = vmatprep.subr.bf16.mxu1 %v1914_v2 }
  0x24   :  { %1304 = vmatmul.mubr.f32.vlgmr.msra.gmra.mrb[0].mxu0 %v35_v51  ;;  %1348 = vmatmul.mubr.f32.vlgmr.msra.gmra.mrb[0].mxu1 %v32_v52  ;;  %v953_v52 = vld [vmem:[%s2373_s3 + $0x60] sm:$0xff] }
  0x25   :  { %1697 = vmatpush3.bf16.msra.mxu0 %v1983_v9  ;;  %1721 = vmatpush3.bf16.msra.mxu1 %v1983_v9 }
  0x26   :  { %1698 = vmatprep.subr.bf16.mxu0 %v1914_v2  ;;  %1722 = vmatprep.subr.bf16.mxu1 %v1914_v2 }
  0x27   :  { %1417 = vmatprep.mubr.msk.f32.mxu1 %vm1915_vm0, %v1916_v4  ;;  %1306 = vmatprep.mubr.f32.mxu0 %v36_v53  ;;  %v954_v53 = vld [vmem:[%s2373_s3 + $0x68] sm:$0xff] }
  0x28   :  { %1307 = vmatmul.mubr.f32.gmra.mrb[2].mxu0 %v37_v54  ;;  %v1887_v54 = vpack.c.bf16 %v954_v53, %v953_v52 }
  0x29   :  { %1700 = vmatpush3.bf16.msra.mxu0 %v1998_v15  ;;  %1724 = vmatpush3.bf16.msra.mxu1 %v1998_v15 }
  0x2a   :  { %1701 = vmatprep.subr.bf16.mxu0 %v1914_v2  ;;  %1725 = vmatprep.subr.bf16.mxu1 %v1914_v2 }
  0x2b   :  { %1309 = vmatprep.mubr.f32.mxu0 %v38_v55  ;;  %v955_v55 = vld [vmem:[%s2373_s3 + $0x70] sm:$0xff] }
  0x2c   :  { %1310 = vmatmul.mubr.f32.gmra.mrb[4].mxu0 %v39_v56  ;;  %v956_v56 = vld [vmem:[%s2373_s3 + $0x78] sm:$0xff] }
  0x2d   :  { %1703 = vmatpush3.bf16.msra.mxu0 %v2014_v21  ;;  %1727 = vmatpush3.bf16.msra.mxu1 %v2014_v21 }
  0x2e   :  { %1704 = vmatprep.subr.bf16.mxu0 %v1914_v2  ;;  %1728 = vmatprep.subr.bf16.mxu1 %v1914_v2 }
  0x2f   :  { %1312 = vmatprep.mubr.f32.mxu0 %v40_v57  ;;  %v1891_v57 = vpack.c.bf16 %v956_v56, %v955_v55 }
  0x30   :  { %1313 = vmatmul.mubr.f32.gmra.mrb[6].mxu0 %v41_v58 }
  0x31   :  { %1706 = vmatpush3.bf16.msra.mxu0 %v2033_v28  ;;  %1730 = vmatpush3.bf16.msra.mxu1 %v2033_v28 }
  0x32   :  { %1707 = vmatprep.subr.bf16.mxu0 %v1914_v2  ;;  %1731 = vmatprep.subr.bf16.mxu1 %v1914_v2 }
  0x33   :  { %1382 = vmatprep.mubr.msk.f32.mxu0 %vm1915_vm0, %v1916_v4 }
  0x35   :  { %1709 = vmatpush3.bf16.msra.mxu0 %v2049_v34  ;;  %1733 = vmatpush3.bf16.msra.mxu1 %v2049_v34 }
  0x36   :  { %1710 = vmatprep.subr.bf16.mxu0 %v1914_v2  ;;  %1734 = vmatprep.subr.bf16.mxu1 %v1914_v2 }
  0x39   :  { %1712 = vmatpush3.bf16.msra.mxu0 %v2065_v40  ;;  %1736 = vmatpush3.bf16.msra.mxu1 %v2065_v40 }
  0x3a   :  { %1713 = vmatprep.subr.bf16.mxu0 %v1914_v2  ;;  %1737 = vmatprep.subr.bf16.mxu1 %v1914_v2 }
  0x3d   :  { %1715 = vmatpush3.bf16.msra.mxu0 %v2081_v46  ;;  %1739 = vmatpush3.bf16.msra.mxu1 %v2081_v46 }
  0x3e   :  { %1716 = vmatprep.subr.bf16.mxu0 %v1914_v2  ;;  %1740 = vmatprep.subr.bf16.mxu1 %v1914_v2 }
  0x41   :  { %1718 = vmatpush3.bf16.msra.mxu0 %v2091_v50  ;;  %1742 = vmatpush3.bf16.msra.mxu1 %v2091_v50 }
  0x42   :  { %1743 = vmatprep.subr.bf16.mxu0 %v1914_v2  ;;  %1767 = vmatprep.subr.bf16.mxu1 %v1914_v2 }
  0xf7   :  { %v1305_v60 = vpop.f32.mrb[0].mxu0  ;;  %v262_v61 = vpop.f32.mrb[0].mxu1 }
  0xf8   :  { %v131_v62 = vpop.f32.mrb[1].mxu0  ;;  %v1349_v63 = vpop.f32.mrb[1].mxu1  ;;  %v137_v12 = vadd.f32 %v1305_v60, %v2160_v59 }
  0xf9   :  { %v132_v0 = vadd.f32 %v2160_v59, %v131_v62 }
  0xfb   :  { %v266_v1 = vadd.f32 %v262_v61, %v132_v0  ;;  %v1308_v5 = vpop.f32.mrb[2].mxu0  ;;  %v1086_v0 = vld [vmem:[%s2374_s5] ss:$0 sm:$0xff] }
  0xfc   :  { %v141_v6 = vpop.f32.mrb[3].mxu0  ;;  %v147_v24 = vadd.f32 %v1308_v5, %v2160_v59 }
  0xfd   :  { %1898 = vtanh.f32 %v266_v1  ;;  %v142_v18 = vadd.f32 %v2160_v59, %v141_v6 }
  0xff   :  { %v2184_v7 = vpop.f32.mrb[4].mxu0 }
 0x100   :  { %v2186_v8 = vpop.f32.mrb[5].mxu0 }
 0x101   :  { %v152_v30 = vadd.f32 %v2160_v59, %v2186_v8 }
 0x103   :  { %v2188_v10 = vpop.f32.mrb[6].mxu0 }
 0x104   :  { %v2190_v11 = vpop.f32.mrb[7].mxu0 }
 0x105   :  { %v162_v58 = vadd.f32 %v2160_v59, %v2190_v11 }
 0x107   :  { %v2163_v3 = vpop.eup %1898 }
 0x108   :  { %1383 = vmatmul.mubr.f32.vlgmr.msra.gmra.mrb[8].mxu0 %v2163_v3 }
 0x109   :  { %1745 = vmatpush3.bf16.msra.mxu0 %v1983_v9  ;;  %1452 = vmatprep.mubr.msk.f32.mxu0 %vm1915_vm0, %v1916_v4 }
 0x10a   :  { %1746 = vmatprep.subr.bf16.mxu0 %v1914_v2 }
 0x10d   :  { %1748 = vmatpush3.bf16.msra.mxu0 %v1998_v15 }
 0x10e   :  { %1749 = vmatprep.subr.bf16.mxu0 %v1914_v2 }
 0x111   :  { %1751 = vmatpush3.bf16.msra.mxu0 %v2014_v21 }
 0x112   :  { %1752 = vmatprep.subr.bf16.mxu0 %v1914_v2 }
 0x115   :  { %1754 = vmatpush3.bf16.msra.mxu0 %v2033_v28 }
 0x116   :  { %1755 = vmatprep.subr.bf16.mxu0 %v1914_v2 }
 0x119   :  { %1757 = vmatpush3.bf16.msra.mxu0 %v2049_v34 }
 0x11a   :  { %1758 = vmatprep.subr.bf16.mxu0 %v1914_v2 }
 0x11d   :  { %1760 = vmatpush3.bf16.msra.mxu0 %v2065_v40 }
 0x11e   :  { %1761 = vmatprep.subr.bf16.mxu0 %v1914_v2 }
 0x121   :  { %1763 = vmatpush3.bf16.msra.mxu0 %v2081_v46 }
 0x122   :  { %1764 = vmatprep.subr.bf16.mxu0 %v1914_v2 }
 0x125   :  { %1766 = vmatpush3.bf16.msra.mxu0 %v2091_v50 }
 0x126   :  { %1791 = vmatprep.subr.bf16.mxu0 %v1914_v2 }
 0x1db   :  { %v355_v13 = vpop.f32.mrb[8].mxu0 }
 0x1dc   :  { %v359_v14 = vadd.f32 %v355_v13, %v137_v12  ;;  %v1384_v16 = vpop.f32.mrb[9].mxu0 }
 0x1de   :  { %1900 = vtanh.f32 %v359_v14 }
 0x1e8   :  { %v2193_v17 = vpop.eup %1900 }
 0x1e9   :  { %1418 = vmatmul.mubr.f32.vlgmr.msra.gmra.mrb[2].mxu1 %v2193_v17 }
 0x1ea   :  { %1769 = vmatpush3.bf16.msra.mxu1 %v1983_v9  ;;  %1487 = vmatprep.mubr.msk.f32.mxu1 %vm1915_vm0, %v1916_v4 }
 0x1eb   :  { %1770 = vmatprep.subr.bf16.mxu1 %v1914_v2 }
 0x1ee   :  { %1772 = vmatpush3.bf16.msra.mxu1 %v1998_v15 }
 0x1ef   :  { %1773 = vmatprep.subr.bf16.mxu1 %v1914_v2 }
 0x1f2   :  { %1775 = vmatpush3.bf16.msra.mxu1 %v2014_v21 }
 0x1f3   :  { %1776 = vmatprep.subr.bf16.mxu1 %v1914_v2 }
 0x1f6   :  { %1778 = vmatpush3.bf16.msra.mxu1 %v2033_v28 }
 0x1f7   :  { %1779 = vmatprep.subr.bf16.mxu1 %v1914_v2 }
 0x1fa   :  { %1781 = vmatpush3.bf16.msra.mxu1 %v2049_v34 }
 0x1fb   :  { %1782 = vmatprep.subr.bf16.mxu1 %v1914_v2 }
 0x1fe   :  { %1784 = vmatpush3.bf16.msra.mxu1 %v2065_v40 }
 0x1ff   :  { %1785 = vmatprep.subr.bf16.mxu1 %v1914_v2 }
 0x202   :  { %1787 = vmatpush3.bf16.msra.mxu1 %v2081_v46 }
 0x203   :  { %1788 = vmatprep.subr.bf16.mxu1 %v1914_v2 }
 0x206   :  { %1790 = vmatpush3.bf16.msra.mxu1 %v2091_v50 }
 0x207   :  { %1815 = vmatprep.subr.bf16.mxu1 %v1914_v2 }
 0x2bc   :  { %v449_v19 = vpop.f32.mrb[2].mxu1 }
 0x2bd   :  { %v453_v20 = vadd.f32 %v449_v19, %v142_v18  ;;  %v1419_v22 = vpop.f32.mrb[3].mxu1  ;;  %v167_v18 = vadd.f32 %v2188_v10, %v2160_v59 }
 0x2bf   :  { %1902 = vtanh.f32 %v453_v20 }
 0x2c9   :  { %v2215_v23 = vpop.eup %1902 }
 0x2ca   :  { %1453 = vmatmul.mubr.f32.vlgmr.msra.gmra.mrb[10].mxu0 %v2215_v23 }
 0x2cb   :  { %1793 = vmatpush3.bf16.msra.mxu0 %v1983_v9  ;;  %1522 = vmatprep.mubr.msk.f32.mxu0 %vm1915_vm0, %v1916_v4 }
 0x2cc   :  { %1794 = vmatprep.subr.bf16.mxu0 %v1914_v2 }
 0x2cf   :  { %1796 = vmatpush3.bf16.msra.mxu0 %v1998_v15 }
 0x2d0   :  { %1797 = vmatprep.subr.bf16.mxu0 %v1914_v2 }
 0x2d3   :  { %1799 = vmatpush3.bf16.msra.mxu0 %v2014_v21 }
 0x2d4   :  { %1800 = vmatprep.subr.bf16.mxu0 %v1914_v2 }
 0x2d7   :  { %1802 = vmatpush3.bf16.msra.mxu0 %v2033_v28 }
 0x2d8   :  { %1803 = vmatprep.subr.bf16.mxu0 %v1914_v2 }
 0x2db   :  { %1805 = vmatpush3.bf16.msra.mxu0 %v2049_v34 }
 0x2dc   :  { %1806 = vmatprep.subr.bf16.mxu0 %v1914_v2 }
 0x2df   :  { %1808 = vmatpush3.bf16.msra.mxu0 %v2065_v40 }
 0x2e0   :  { %1809 = vmatprep.subr.bf16.mxu0 %v1914_v2 }
 0x2e3   :  { %1811 = vmatpush3.bf16.msra.mxu0 %v2081_v46 }
 0x2e4   :  { %1812 = vmatprep.subr.bf16.mxu0 %v1914_v2 }
 0x2e7   :  { %1814 = vmatpush3.bf16.msra.mxu0 %v2091_v50 }
 0x2e8   :  { %1839 = vmatprep.subr.bf16.mxu0 %v1914_v2 }
 0x39d   :  { %v543_v25 = vpop.f32.mrb[10].mxu0 }
 0x39e   :  { %v547_v26 = vadd.f32 %v543_v25, %v147_v24  ;;  %v1454_v27 = vpop.f32.mrb[11].mxu0 }
 0x3a0   :  { %1904 = vtanh.f32 %v547_v26 }
 0x3aa   :  { %v2237_v29 = vpop.eup %1904 }
 0x3ab   :  { %1488 = vmatmul.mubr.f32.vlgmr.msra.gmra.mrb[4].mxu1 %v2237_v29 }
 0x3ac   :  { %1817 = vmatpush3.bf16.msra.mxu1 %v1983_v9  ;;  %1557 = vmatprep.mubr.msk.f32.mxu1 %vm1915_vm0, %v1916_v4 }
 0x3ad   :  { %1818 = vmatprep.subr.bf16.mxu1 %v1914_v2 }
 0x3b0   :  { %1820 = vmatpush3.bf16.msra.mxu1 %v1998_v15 }
 0x3b1   :  { %1821 = vmatprep.subr.bf16.mxu1 %v1914_v2 }
 0x3b4   :  { %1823 = vmatpush3.bf16.msra.mxu1 %v2014_v21 }
 0x3b5   :  { %1824 = vmatprep.subr.bf16.mxu1 %v1914_v2 }
 0x3b8   :  { %1826 = vmatpush3.bf16.msra.mxu1 %v2033_v28 }
 0x3b9   :  { %1827 = vmatprep.subr.bf16.mxu1 %v1914_v2 }
 0x3bc   :  { %1829 = vmatpush3.bf16.msra.mxu1 %v2049_v34 }
 0x3bd   :  { %1830 = vmatprep.subr.bf16.mxu1 %v1914_v2 }
 0x3c0   :  { %1832 = vmatpush3.bf16.msra.mxu1 %v2065_v40 }
 0x3c1   :  { %1833 = vmatprep.subr.bf16.mxu1 %v1914_v2 }
 0x3c4   :  { %1835 = vmatpush3.bf16.msra.mxu1 %v2081_v46 }
 0x3c5   :  { %1836 = vmatprep.subr.bf16.mxu1 %v1914_v2 }
 0x3c8   :  { %1838 = vmatpush3.bf16.msra.mxu1 %v2091_v50 }
 0x47e   :  { %v637_v31 = vpop.f32.mrb[4].mxu1 }
 0x47f   :  { %v641_v32 = vadd.f32 %v637_v31, %v152_v30  ;;  %v1489_v33 = vpop.f32.mrb[5].mxu1 }
 0x481   :  { %1906 = vtanh.f32 %v641_v32 }
 0x48b   :  { %v2259_v35 = vpop.eup %1906 }
 0x48c   :  { %1523 = vmatmul.mubr.f32.vlgmr.msra.gmra.mrb[12].mxu0 %v2259_v35 }
 0x48d   :  { %1841 = vmatpush3.bf16.msra.mxu0 %v1983_v9  ;;  %1592 = vmatprep.mubr.msk.f32.mxu0 %vm1915_vm0, %v1916_v4  ;;  %v941_v4 = vld [vmem:[%s2373_s3] sm:$0xff]  ;;  %v942_v9 = vld [vmem:[%s2373_s3 + $0x8] sm:$0xff] }
 0x48e   :  { %1842 = vmatprep.subr.bf16.mxu0 %v1914_v2 }
 0x491   :  { %1844 = vmatpush3.bf16.msra.mxu0 %v1998_v15  ;;  %v1863_v15 = vpack.c.bf16 %v942_v9, %v941_v4 }
 0x492   :  { %1845 = vmatprep.subr.bf16.mxu0 %v1914_v2 }
 0x493   :  { %1864 = vmatprep.subr.bf16.mxu1 %v1863_v15 }
 0x495   :  { %1847 = vmatpush3.bf16.msra.mxu0 %v2014_v21  ;;  %v157_v21 = vadd.f32 %v2184_v7, %v2160_v59 }
 0x496   :  { %1848 = vmatprep.subr.bf16.mxu0 %v1914_v2 }
 0x499   :  { %1850 = vmatpush3.bf16.msra.mxu0 %v2033_v28 }
 0x49a   :  { %1851 = vmatprep.subr.bf16.mxu0 %v1914_v2 }
 0x49d   :  { %1853 = vmatpush3.bf16.msra.mxu0 %v2049_v34 }
 0x49e   :  { %1854 = vmatprep.subr.bf16.mxu0 %v1914_v2 }
 0x4a1   :  { %1856 = vmatpush3.bf16.msra.mxu0 %v2065_v40  ;;  %v945_v40 = vld [vmem:[%s2373_s3 + $0x20] sm:$0xff] }
 0x4a2   :  { %1857 = vmatprep.subr.bf16.mxu0 %v1914_v2  ;;  %v1871_v42 = vpack.c.bf16 %v946_v41, %v945_v40 }
 0x4a5   :  { %1859 = vmatpush3.bf16.msra.mxu0 %v2081_v46  ;;  %v949_v46 = vld [vmem:[%s2373_s3 + $0x40] sm:$0xff] }
 0x4a6   :  { %1860 = vmatprep.subr.bf16.mxu0 %v1914_v2  ;;  %v943_v2 = vld [vmem:[%s2373_s3 + $0x10] sm:$0xff]  ;;  %v1879_v48 = vpack.c.bf16 %v950_v47, %v949_v46 }
 0x4a7   :  { %v1867_v38 = vpack.c.bf16 %v944_v37, %v943_v2 }
 0x4a9   :  { %1862 = vmatpush3.bf16.msra.mxu0 %v2091_v50  ;;  %v952_v50 = vld [vmem:[%s2373_s3 + $0x58] sm:$0xff] }
 0x4aa   :  { %v1883_v51 = vpack.c.bf16 %v952_v50, %v951_v49 }
 0x55f   :  { %v731_v28 = vpop.f32.mrb[12].mxu0 }
 0x560   :  { %v735_v34 = vadd.f32 %v731_v28, %v157_v21  ;;  %v1524_v36 = vpop.f32.mrb[13].mxu0 }
 0x562   :  { %1908 = vtanh.f32 %v735_v34 }
 0x56c   :  { %v1909_v39 = vpop.eup %1908 }
 0x56d   :  { %1558 = vmatmul.mubr.f32.vlgmr.msra.gmra.mrb[6].mxu1 %v1909_v39 }
 0x56e   :  { %1866 = vmatpush3.bf16.msra.mxu1 %v1863_v15  ;;  %1627 = vmatprep.mubr.f32.mxu1 %v2163_v3 }
 0x56f   :  { %1868 = vmatprep.subr.bf16.mxu1 %v1867_v38 }
 0x572   :  { %1870 = vmatpush3.bf16.msra.mxu1 %v1867_v38 }
 0x573   :  { %1872 = vmatprep.subr.bf16.mxu1 %v1871_v42 }
 0x576   :  { %1874 = vmatpush3.bf16.msra.mxu1 %v1871_v42 }
 0x577   :  { %1876 = vmatprep.subr.bf16.mxu1 %v1875_v45 }
 0x57a   :  { %1878 = vmatpush3.bf16.msra.mxu1 %v1875_v45 }
 0x57b   :  { %1880 = vmatprep.subr.bf16.mxu1 %v1879_v48 }
 0x57e   :  { %1882 = vmatpush3.bf16.msra.mxu1 %v1879_v48 }
 0x57f   :  { %1884 = vmatprep.subr.bf16.mxu1 %v1883_v51 }
 0x582   :  { %1886 = vmatpush3.bf16.msra.mxu1 %v1883_v51 }
 0x583   :  { %1888 = vmatprep.subr.bf16.mxu1 %v1887_v54 }
 0x586   :  { %1890 = vmatpush3.bf16.msra.mxu1 %v1887_v54 }
 0x587   :  { %1892 = vmatprep.subr.bf16.mxu1 %v1891_v57 }
 0x58a   :  { %1894 = vmatpush3.bf16.msra.mxu1 %v1891_v57 }
 0x58d   :  { %1628 = vmatmul.mubr.f32.vlgmr.msra.gmra.mrb[8].mxu1 %v2193_v17 }
 0x58e   :  { %1630 = vmatprep.mubr.f32.mxu1 %v2215_v23 }
 0x591   :  { %1631 = vmatmul.mubr.f32.gmra.mrb[10].mxu1 %v2237_v29 }
 0x592   :  { %1633 = vmatprep.mubr.f32.mxu1 %v2259_v35 }
 0x595   :  { %1634 = vmatmul.mubr.f32.gmra.mrb[12].mxu1 %v1909_v39 }
 0x640   :  { %v825_v60 = vpop.f32.mrb[6].mxu1 }
 0x641   :  { %v829_v61 = vadd.f32 %v825_v60, %v162_v58  ;;  %v1559_v62 = vpop.f32.mrb[7].mxu1 }
 0x643   :  { %1910 = vtanh.f32 %v829_v61 }
 0x64d   :  { %v1911_v63 = vpop.eup %1910 }
 0x64e   :  { %1593 = vmatmul.mubr.f32.vlgmr.msra.gmra.mrb[14].mxu0 %v1911_v63  ;;  %1636 = vmatprep.mubr.f32.mxu1 %v1911_v63 }
 0x660   :  { %v1629_v1 = vpop.f32.mrb[8].mxu1 }
 0x661   :  { %v1036_v3 = vadd.f32 %v1629_v1, %v1086_v0  ;;  %v1030_v5 = vpop.f32.mrb[9].mxu1 }
 0x662   :  { %v1031_v6 = vadd.f32 %v1086_v0, %v1030_v5 }
 0x663   :  { %1070 = vst [vmem:[%s2375_s7 + $0x8] sm:$0xff] %v1036_v3 }
 0x664   :  { %1069 = vst [vmem:[%s2375_s7] sm:$0xff] %v1031_v6  ;;  %v1632_v7 = vpop.f32.mrb[10].mxu1 }
 0x665   :  { %v1046_v8 = vadd.f32 %v1632_v7, %v1086_v0  ;;  %v1040_v11 = vpop.f32.mrb[11].mxu1 }
 0x666   :  { %v1041_v12 = vadd.f32 %v1086_v0, %v1040_v11 }
 0x667   :  { %1072 = vst [vmem:[%s2375_s7 + $0x18] sm:$0xff] %v1046_v8 }
 0x668   :  { %1071 = vst [vmem:[%s2375_s7 + $0x10] sm:$0xff] %v1041_v12  ;;  %v1635_v13 = vpop.f32.mrb[12].mxu1 }
 0x669   :  { %v1056_v14 = vadd.f32 %v1635_v13, %v1086_v0  ;;  %v1050_v16 = vpop.f32.mrb[13].mxu1 }
 0x66a   :  { %v1051_v17 = vadd.f32 %v1086_v0, %v1050_v16 }
 0x66b   :  { %1074 = vst [vmem:[%s2375_s7 + $0x28] sm:$0xff] %v1056_v14 }
 0x66c   :  { %1073 = vst [vmem:[%s2375_s7 + $0x20] sm:$0xff] %v1051_v17 }
 0x721   :  { %v919_v19 = vpop.f32.mrb[14].mxu0 }
 0x722   :  { %v923_v20 = vadd.f32 %v919_v19, %v167_v18  ;;  %v1594_v22 = vpop.f32.mrb[15].mxu0 }
 0x724   :  { %1912 = vtanh.f32 %v923_v20 }
 0x72e   :  { %v1913_v23 = vpop.eup %1912 }
 0x72f   :  { %932 = vst [vmem:[%s2376_s8] sm:$0xff] %v1913_v23  ;;  %1637 = vmatmul.mubr.f32.gmra.mrb[14].mxu1 %v1913_v23 }
 0x802   :  { %v1638_v24 = vpop.f32.mrb[14].mxu1 }
 0x803   :  { %v1066_v25 = vadd.f32 %v1638_v24, %v1086_v0  ;;  %v1060_v26 = vpop.f32.mrb[15].mxu1 }
 0x804   :  { %v1061_v27 = vadd.f32 %v1086_v0, %v1060_v26 }
 0x805   :  { %1076 = vst [vmem:[%s2375_s7 + $0x38] sm:$0xff] %v1066_v25 }
 0x806   :  { %1075 = vst [vmem:[%s2375_s7 + $0x30] sm:$0xff] %v1061_v27 }

</bundles_post_ra>
